<compile_context>
chip_gen: v6e
topology: v6e:2x2x1
jax: 0.10.0
libtpu: 0.0.40
codegen_flags: <defaults>
</compile_context>

<pallas_src>
import functools

import jax
import jax.numpy as jnp
from jax.experimental import pallas as pl
from jax.experimental.pallas import tpu as pltpu

LANES = 128

# Inputs at or below this many bytes go through the single-block fast path.
# The large path now uses ~2 MiB blocks, so there is no perf cliff above it.
FAST_PATH_MAX_BYTES = 2 << 20          # 2 MiB

# Large-path tiling: ~0.5M elements per grid step (2 MiB f32 / 1 MiB bf16).
TARGET_BLOCK_ELEMS = 512 * 1024

# softplus(-PAD_VALUE) == 0.0 exactly in f32, so padded elements add nothing.
PAD_VALUE = 1.0e4


def _softplus_neg_f32(x):
    """Numerically stable softplus(-x) in float32 (log1p form, matches torch)."""
    xf = x if x.dtype == jnp.float32 else x.astype(jnp.float32)
    return jnp.maximum(-xf, 0.0) + jnp.log1p(jnp.exp(-jnp.abs(xf)))


def _nsgan_fast_kernel(inv_n, x_ref, o_ref):
    """Single-block path: whole array in one VMEM tile, write the mean."""
    o_ref[0, 0] = jnp.sum(_softplus_neg_f32(x_ref[...])) * jnp.float32(inv_n)


def _nsgan_sum_kernel(rows_valid, block_rows, x_ref, o_ref, acc_ref):
    """Tiled path: per-lane partial sums in a VMEM accumulator, final reduce once.

    The slab's row count need not be a multiple of `block_rows`; the single
    ragged edge block is masked in-kernel, so no host-side padding copy of the
    input is ever needed on this path.
    """
    i = pl.program_id(0)
    last = pl.num_programs(0) - 1

    @pl.when(i == 0)
    def _():
        acc_ref[...] = jnp.zeros_like(acc_ref)

    sp = _softplus_neg_f32(x_ref[...])                 # (block_rows, width) f32

    rem = rows_valid % block_rows                       # static Python int
    if rem == 0:
        acc_ref[...] += jnp.sum(sp, axis=0, keepdims=True)
    else:
        @pl.when(i != last)
        def _():
            acc_ref[...] += jnp.sum(sp, axis=0, keepdims=True)

        @pl.when(i == last)
        def _():
            # Rows >= rem in the edge block are out-of-bounds garbage; zero them.
            row = jax.lax.broadcasted_iota(jnp.int32, sp.shape, 0)
            acc_ref[...] += jnp.sum(
                jnp.where(row < rem, sp, 0.0), axis=0, keepdims=True
            )

    @pl.when(i == last)
    def _():
        o_ref[0, 0] = jnp.sum(acc_ref[...])             # single cross-lane reduce


def nsgan_loss_generator(discriminator_prediction_fake: jax.Array) -> jax.Array:
    """Pallas TPU implementation of NSGANLossGenerator.forward."""
    x = discriminator_prediction_fake
    n_true = int(x.size)
    if n_true == 0:                                     # torch: mean of empty = nan
        return jnp.full((), jnp.nan, dtype=x.dtype)
    inv_n = 1.0 / float(n_true)                         # exact host-side reciprocal

    flat = x.reshape(-1)                                # free: contiguous view
    n = n_true
    if n % LANES != 0:
        # Rare fallback: lane-unaligned sizes need a real pad (host copy) so the
        # flat array can be viewed as a lane-dense 2-D slab.  PAD_VALUE adds 0.
        # TODO(synk): avoid this copy with a manual-DMA ragged tail if it matters.
        pad = (-n) % (8 * LANES)
        flat = jnp.pad(flat, (0, pad),
                       constant_values=jnp.asarray(PAD_VALUE, x.dtype))
        n = n + pad

    nbytes = n * x.dtype.itemsize
    cost = pl.CostEstimate(
        flops=7 * n_true, transcendentals=2 * n_true, bytes_accessed=nbytes
    )

    if nbytes <= FAST_PATH_MAX_BYTES:
        # ---- Fast path: one full-array block, no pipeline machinery. ----
        xb = flat.reshape(n // LANES, LANES)
        out = pl.pallas_call(
            functools.partial(_nsgan_fast_kernel, inv_n),
            out_shape=jax.ShapeDtypeStruct((1, 1), jnp.float32),
            grid_spec=pltpu.PrefetchScalarGridSpec(
                num_scalar_prefetch=0,
                grid=(1,),
                in_specs=[pl.BlockSpec(xb.shape, lambda i: (0, 0))],
                out_specs=pl.BlockSpec(
                    (1, 1), lambda i: (0, 0), memory_space=pltpu.SMEM
                ),
            ),
            compiler_params=pltpu.CompilerParams(
                dimension_semantics=("arbitrary",),
                vmem_limit_bytes=32 * 1024 * 1024,
            ),
            cost_estimate=cost,
        )(xb)
        return out[0, 0].astype(x.dtype)

    # ---- Large path: lane-dense slab, ~2 MiB blocks, in-kernel tail mask. ----
    width = next(w for w in (512, 256, 128) if n % w == 0)
    rows = n // width
    block_rows = TARGET_BLOCK_ELEMS // width
    if rows < block_rows:                               # defensive; not hit for f32/bf16
        block_rows = max(32, (rows // 32) * 32)
    num_blocks = pl.cdiv(rows, block_rows)
    slab = flat.reshape(rows, width)                    # free: contiguous view

    out = pl.pallas_call(
        functools.partial(_nsgan_sum_kernel, rows, block_rows),
        out_shape=jax.ShapeDtypeStruct((1, 1), jnp.float32),
        grid_spec=pltpu.PrefetchScalarGridSpec(
            num_scalar_prefetch=0,
            grid=(num_blocks,),
            in_specs=[pl.BlockSpec((block_rows, width), lambda i: (i, 0))],
            out_specs=pl.BlockSpec(
                (1, 1), lambda i: (0, 0), memory_space=pltpu.SMEM
            ),
            scratch_shapes=[pltpu.VMEM((1, width), jnp.float32)],
        ),
        compiler_params=pltpu.CompilerParams(
            dimension_semantics=("arbitrary",),
            vmem_limit_bytes=32 * 1024 * 1024,
        ),
        cost_estimate=cost,
    )(slab)
    return (out[0, 0] * jnp.float32(inv_n)).astype(x.dtype)


if __name__ == "__main__":
    key = jax.random.PRNGKey(0)

    # Typical small patch-GAN style discriminator output.
    x = jax.random.normal(key, (2, 4, 16, 16), dtype=jnp.float32)
    loss = nsgan_loss_generator(x)
    jax.block_until_ready(loss)
    ref = jnp.mean(jax.nn.softplus(-x))
    assert jnp.allclose(loss, ref, rtol=1e-5, atol=1e-6), (loss, ref)

    # Lane-unaligned small input (exercises the padded fast path).
    x_odd = jax.random.normal(jax.random.PRNGKey(2), (7, 11, 13), dtype=jnp.float32)
    loss_odd = nsgan_loss_generator(x_odd)
    jax.block_until_ready(loss_odd)
    ref_odd = jnp.mean(jax.nn.softplus(-x_odd))
    assert jnp.allclose(loss_odd, ref_odd, rtol=1e-5, atol=1e-6), (loss_odd, ref_odd)

    # Large input (no-copy tiled path with a masked ragged edge block).
    x_big = jax.random.normal(jax.random.PRNGKey(1), (3, 8, 240, 256), dtype=jnp.float32)
    loss_big = nsgan_loss_generator(x_big)
    jax.block_until_ready(loss_big)
    ref_big = jnp.mean(jax.nn.softplus(-x_big))
    assert jnp.allclose(loss_big, ref_big, rtol=1e-4, atol=1e-5), (loss_big, ref_big)

    print("KERNEL_OK")
</pallas_src>

<mosaic_0001>
module attributes {stable_mosaic.version = 11 : i64} {
  func.func @_nsgan_fast_kernel(%arg0: i32, %arg1: memref<16x128xf32, #tpu.memory_space<vmem>>, %arg2: memref<1x1xf32, #tpu.memory_space<smem>>) attributes {dimension_semantics = [#tpu.dimension_semantics<arbitrary>], iteration_bounds = array<i64: 1>, scalar_prefetch = 0 : i64, scratch_operands = 0 : i64, tpu.core_type = #tpu.core_type<tc>, window_params = [{pipeline_mode = #tpu.pipeline_mode<synchronous>, transform_indices = @transform_0, window_bounds = array<i64: 16, 128>}, {transform_indices = @transform_1, window_bounds = array<i64: 1, 1>}]} {
    %c0 = arith.constant 0 : index
    %c0_0 = arith.constant 0 : index
    %0 = vector.load %arg1[%c0, %c0_0] : memref<16x128xf32, #tpu.memory_space<vmem>>, vector<16x128xf32>
    %cst = arith.constant 0.000000e+00 : f32
    %1 = vector.broadcast %cst : f32 to vector<16x128xf32>
    %2 = arith.subf %1, %0 : vector<16x128xf32>
    %cst_1 = arith.constant 0.000000e+00 : f32
    %3 = vector.broadcast %cst_1 : f32 to vector<16x128xf32>
    %4 = arith.maximumf %2, %3 : vector<16x128xf32>
    %5 = math.absf %0 : vector<16x128xf32>
    %cst_2 = arith.constant 0.000000e+00 : f32
    %6 = vector.broadcast %cst_2 : f32 to vector<16x128xf32>
    %7 = arith.subf %6, %5 : vector<16x128xf32>
    %8 = math.exp %7 : vector<16x128xf32>
    %9 = math.log1p %8 : vector<16x128xf32>
    %10 = arith.addf %4, %9 : vector<16x128xf32>
    %11 = vector.shape_cast %10 : vector<16x128xf32> to vector<1x16x128xf32>
    %cst_3 = arith.constant dense<0.000000e+00> : vector<1xf32>
    %12 = vector.multi_reduction <add>, %11, %cst_3 [1, 2] : vector<1x16x128xf32> to vector<1xf32>
    %13 = vector.shape_cast %12 : vector<1xf32> to vector<1x1x1xf32>
    %14 = vector.extract %13[0, 0, 0] : f32 from vector<1x1x1xf32>
    %cst_4 = arith.constant 4.8828125E-4 : f32
    %15 = arith.mulf %14, %cst_4 : f32
    %c0_5 = arith.constant 0 : index
    %c0_6 = arith.constant 0 : index
    %16 = memref.load %arg2[%c0_5, %c0_6] : memref<1x1xf32, #tpu.memory_space<smem>>
    memref.store %15, %arg2[%c0_5, %c0_6] : memref<1x1xf32, #tpu.memory_space<smem>>
    return
  }
  func.func @transform_0(%arg0: i32) -> (i32, i32) {
    %c0_i32 = arith.constant 0 : i32
    %c0_i32_0 = arith.constant 0 : i32
    %c0_i32_1 = arith.constant 0 : i32
    return %c0_i32, %c0_i32_0 : i32, i32
  }
  func.func @transform_1(%arg0: i32) -> (i32, i32) {
    %c0_i32 = arith.constant 0 : i32
    %c0_i32_0 = arith.constant 0 : i32
    %c0_i32_1 = arith.constant 0 : i32
    return %c0_i32, %c0_i32_0 : i32, i32
  }
}

</mosaic_0001>

<bundles_post_ra>
// kernel: tpu_custom_call.1
= control target key start
LH: loop header
LB: loop body
LE: loop exit
PB: predicated region body
PF: predicated region fallthrough
CT: control target
= control target key end

     0   :  { %6 = vsyncpa [#allocation3], 0  ;;  %s150_s0 = inlined_call_operand.hbm [shape: f32[16,128], index: 0, kind: input, shape index: {}]   ;;  %s151_s1 = inlined_call_operand.hbm [shape: f32[1,1], index: 1, kind: output, shape index: {}]  }
   0x1   :  { %7 = vsyncpa [#allocation4], 0  ;;  %s130_s6 = smov [#allocation2]  }
   0x2   :  { %s13_s7 = sshll.u32 %s130_s6, 4  ;;  %s14_s7 = int_to_ptr.vmem [resolvable:$true] %s13_s7 }
   0x3   :  { %s106_s8 = scalar_lea.vmem %s14_s7, 256  ;;  %p111_p1 = scmp.lt.s32.totalorder %s14_s7, %s14_s7 }
   0x4   :  { %p107_p0 = scmp.ne.s32.totalorder %s14_s7, %s106_s8  ;;  %p112_p2 = scmp.lt.s32.totalorder %s106_s8, %s106_s8 }
   0x6   :  { %p113_p3 = por %p112_p2, %p111_p1 }
   0x8   :  { %p114_p4 = pnand %p113_p3, %p107_p0 }
   0xa   :  { %117 = shalt.err (!%p114_p4)
}
   0xb   :  { %s131_s9 = smov 128   ;;  %s132_s10 = smov 8  }
   0xc   :  { %19 = dma.hbm_to_vmem [thread:$0]  %s150_s0, 256, %s14_s7, [#allocation3], %s131_s9, %s131_s9, %s132_s10  }
   0xd   :  { %126 = dma.done.wait [#allocation3], 256  }
   0xe   :  { %127 = vsyncadd [#allocation3], 4294967040  ;;  %v23_v0 = vld [vmem:[#allocation2] sm:$0xff]  ;;  %v24_v1 = vld [vmem:[#allocation2 + $0x8] sm:$0xff]  ;;  %s133_s14 = smov [#allocation5]  }
   0xf   :  { %v29_v2 = vand.u32 2147483647, %v23_v0  ;;  %v30_v3 = vand.u32 2147483647, %v24_v1  ;;  %v25_v15 = vsub.f32 0.0, %v23_v0  ;;  %v26_v18 = vsub.f32 0.0, %v24_v1 }
  0x11   :  { %v31_v4 = vsub.f32 0.0, %v29_v2  ;;  %v32_v5 = vsub.f32 0.0, %v30_v3  ;;  %v27_v22 = vmax.f32 %v25_v15, 0.0  ;;  %v28_v25 = vmax.f32 %v26_v18, 0.0 }
  0x13   :  { %v33_v6 = vmul.f32 1.442695, %v31_v4  ;;  %v35_v7 = vmul.f32 1.442695, %v32_v5 }
  0x15   :  { %90 = vpow2.f32 %v33_v6 }
  0x16   :  { %92 = vpow2.f32 %v35_v7 }
  0x22   :  { %v91_v8 = vpop.eup %90 }
  0x23   :  { %v93_v9 = vpop.eup %92  ;;  %v37_v10 = vadd.f32 1.0, %v91_v8  ;;  %v40_v12 = vmul.f32 -0.5, %v91_v8  ;;  %v43_v16 = vand.u32 2147483647, %v91_v8 }
  0x24   :  { %v46_v11 = vadd.f32 1.0, %v93_v9  ;;  %v49_v13 = vmul.f32 -0.5, %v93_v9  ;;  %v52_v19 = vand.u32 2147483647, %v93_v9 }
  0x25   :  { %94 = vlog2.f32 %v37_v10  ;;  %v41_v14 = vadd.f32 1.0, %v40_v12  ;;  %vm44_vm0 = vcmp.lt.f32.partialorder %v43_v16, 0.0004427343 }
  0x26   :  { %96 = vlog2.f32 %v46_v11  ;;  %v50_v17 = vadd.f32 1.0, %v49_v13  ;;  %vm53_vm1 = vcmp.lt.f32.partialorder %v52_v19, 0.0004427343 }
  0x27   :  { %v42_v20 = vmul.f32 %v91_v8, %v41_v14 }
  0x28   :  { %v51_v23 = vmul.f32 %v93_v9, %v50_v17 }
  0x32   :  { %v95_v21 = vpop.eup %94 }
  0x33   :  { %v97_v24 = vpop.eup %96  ;;  %v39_v26 = vmul.f32 0.6931472, %v95_v21 }
  0x34   :  { %v48_v27 = vmul.f32 0.6931472, %v97_v24 }
  0x35   :  { %v45_v28 = vsel %vm44_vm0, %v42_v20, %v39_v26 }
  0x36   :  { %v54_v29 = vsel %vm53_vm1, %v51_v23, %v48_v27  ;;  %v55_v30 = vadd.f32 %v45_v28, %v27_v22 }
  0x37   :  { %v56_v31 = vadd.f32 %v54_v29, %v28_v25 }
  0x39   :  { %v57_v32 = vadd.f32 %v56_v31, %v55_v30 }
  0x3b   :  { %58 = vadd.xlane.f32.xlu0 %v57_v32 }
  0xc4   :  { %v59_v33 = vpop.xlane.xlu0 %58 }
  0xc5   :  { %v60_v34 = vrot.slane %v59_v33, 4 }
  0xc7   :  { %v61_v35 = vadd.f32 %v60_v34, %v59_v33 }
  0xc9   :  { %v62_v36 = vrot.slane %v61_v35, 2 }
  0xcb   :  { %v63_v37 = vadd.f32 %v62_v36, %v61_v35 }
  0xcd   :  { %v64_v38 = vrot.slane %v63_v37, 1 }
  0xcf   :  { %v65_v39 = vadd.f32 %v64_v38, %v63_v37 }
  0xd1   :  { %84 = vpush %v65_v39 }
 0x102   :  { %s85_s0 = spop %84 }
 0x103   :  { %s67_s13 = smul.f32 0.00048828125, %s85_s0 }
 0x105   :  { %69 = sst [smem:[#allocation5]] %s67_s13 }
 0x106   :  { %77 = dma.smem_to_hbm %s133_s14, 16, %s151_s1, [#allocation4]  }
 0x107   :  { %128 = dma.done.wait [#allocation4], 16  }
 0x108   :  { %129 = vsyncadd [#allocation4], 4294967280 }
 0x109   :  { %81 = sfence }
 0x10a   :  { %82 = vsyncpa [#allocation3], 1 }
 0x10b   :  { %83 = vsyncpa [#allocation4], 1 }

</bundles_post_ra>
